<compile_context>
chip_gen: v5e
topology: v5e:2x2
jax: 0.10.0
libtpu: 0.0.40
codegen_flags: <defaults>
</compile_context>

<pallas_src>
import functools

import jax
import jax.numpy as jnp
from jax.experimental import pallas as pl
from jax.experimental.pallas import tpu as pltpu

_SUBLANES = 8
_LANES = 128


def _noisy_ce_kernel(logits_ref, targets_ref, out_ref, *, p_noisy, n_total, tile_n):
    pid = pl.program_id(0)

    # All math in f32 (v5e has no bf16 VPU/EUP); bf16 only saves HBM bytes.
    logits = logits_ref[...].astype(jnp.float32)          # (tile_n, C)
    tgt = targets_ref[...]                                 # (tile_n, 1) int32
    tn, c = logits.shape

    # Target selection mask from a lane iota (no gather on TPU).
    col = jax.lax.broadcasted_iota(jnp.int32, (tn, c), 1)
    select = col == tgt                                    # (tile_n, C) bool

    # Numerically-stable log-softmax pieces, single pass over the tile.
    row_max = jnp.max(logits, axis=-1, keepdims=True)      # (tile_n, 1)
    shifted = logits - row_max                             # (tile_n, C)
    sum_exp = jnp.sum(jnp.exp(shifted), axis=-1, keepdims=True)
    log_sum_exp = jnp.log(sum_exp)                         # (tile_n, 1)

    # Fused target-logit extraction (no float one-hot, no extra full-width mul):
    # tgt_shifted = logits[target] - row_max
    tgt_shifted = jnp.sum(jnp.where(select, shifted, 0.0), axis=-1, keepdims=True)

    losses = log_sum_exp - tgt_shifted                     # = lse - logits[target]
    conf = jnp.exp(tgt_shifted - log_sum_exp)              # softmax prob of target
    weights = (1.0 - p_noisy) + p_noisy * conf

    # Mask rows past the true batch size (last partial tile holds padding; the
    # where-select discards any garbage/NaN those rows may have produced).
    row = pid * tile_n + jax.lax.broadcasted_iota(jnp.int32, (tn, 1), 0)
    contrib = jnp.where(row < n_total, losses * weights, 0.0)

    # Lane-dense per-tile partial sum: full (8, 128) unmasked store, no
    # serial accumulator, so the batch grid axis can stay "parallel".
    tile_sum = jnp.sum(contrib)
    out_ref[...] = jnp.broadcast_to(tile_sum, (1, _SUBLANES, _LANES))


def _pick_tile_n(n, c, itemsize):
    """Largest batch tile that keeps 2 pipeline buffers well inside scoped VMEM."""
    if itemsize >= 4:
        sub = 8
    elif itemsize == 2:
        sub = 16
    else:
        sub = 32
    budget_bytes = 8 * 1024 * 1024            # 2 double-buffered logits tiles
    tile = budget_bytes // max(1, 2 * c * itemsize)
    tile = max(sub, min(tile, 1024))
    tile = (tile // sub) * sub
    n_rounded = -(-n // sub) * sub
    return max(sub, min(tile, n_rounded))


def noisy_cross_entropy_loss(logits, targets, p_noisy):
    """logits: (N, C) float (f32 or bf16), targets: (N,) int -> scalar float32."""
    n, c = logits.shape
    targets_2d = targets.astype(jnp.int32).reshape(n, 1)

    tile_n = _pick_tile_n(n, c, jnp.dtype(logits.dtype).itemsize)
    num_tiles = pl.cdiv(n, tile_n)

    # TODO(synk): for vocab-scale C (tile no longer fits double-buffered), add a
    # trailing "arbitrary" class-dim grid axis with an online logsumexp.
    partials = pl.pallas_call(
        functools.partial(
            _noisy_ce_kernel, p_noisy=float(p_noisy), n_total=n, tile_n=tile_n
        ),
        out_shape=jax.ShapeDtypeStruct((num_tiles, _SUBLANES, _LANES), jnp.float32),
        grid=(num_tiles,),
        in_specs=[
            pl.BlockSpec((tile_n, c), lambda i: (i, 0)),
            pl.BlockSpec((tile_n, 1), lambda i: (i, 0)),
        ],
        out_specs=pl.BlockSpec((1, _SUBLANES, _LANES), lambda i: (i, 0, 0)),
        compiler_params=pltpu.CompilerParams(
            dimension_semantics=("parallel",),
            vmem_limit_bytes=32 * 1024 * 1024,
        ),
    )(logits, targets_2d)

    # Tiny final reduction over per-tile partial sums (num_tiles scalars).
    return jnp.sum(partials[:, 0, 0]) / jnp.float32(n)


def _reference(logits, targets, p_noisy):
    logits = logits.astype(jnp.float32)
    lse = jax.nn.logsumexp(logits, axis=1)
    tgt_logit = jnp.take_along_axis(logits, targets[:, None], axis=1)[:, 0]
    losses = lse - tgt_logit
    conf = jnp.exp(tgt_logit - lse)
    weights = 1.0 - p_noisy + p_noisy * conf
    return jnp.mean(losses * weights)


if __name__ == "__main__":
    key = jax.random.PRNGKey(0)
    P_NOISY = 0.2

    # Case 1: batch a multiple of the sublane count.
    k1, k2, k3, k4 = jax.random.split(key, 4)
    N1, C1 = 8, 32
    logits1 = jax.random.normal(k1, (N1, C1), dtype=jnp.float32)
    targets1 = jax.random.randint(k2, (N1,), 0, C1, dtype=jnp.int32)
    out1 = jax.block_until_ready(noisy_cross_entropy_loss(logits1, targets1, P_NOISY))
    ref1 = _reference(logits1, targets1, P_NOISY)
    assert jnp.allclose(out1, ref1, atol=1e-5, rtol=1e-5), (out1, ref1)

    # Case 2: ragged batch (exercises the padded-row masking in the last tile).
    N2, C2 = 19, 40
    logits2 = jax.random.normal(k3, (N2, C2), dtype=jnp.float32)
    targets2 = jax.random.randint(k4, (N2,), 0, C2, dtype=jnp.int32)
    out2 = jax.block_until_ready(noisy_cross_entropy_loss(logits2, targets2, P_NOISY))
    ref2 = _reference(logits2, targets2, P_NOISY)
    assert jnp.allclose(out2, ref2, atol=1e-5, rtol=1e-5), (out2, ref2)

    print("KERNEL_OK")
</pallas_src>

<mosaic_0001>
module attributes {stable_mosaic.version = 11 : i64} {
  func.func @_noisy_ce_kernel(%arg0: i32, %arg1: memref<8x32xf32, #tpu.memory_space<vmem>>, %arg2: memref<8x1xi32, #tpu.memory_space<vmem>>, %arg3: memref<1x8x128xf32, #tpu.memory_space<vmem>>) attributes {dimension_semantics = [#tpu.dimension_semantics<parallel>], iteration_bounds = array<i64: 1>, scalar_prefetch = 0 : i64, scratch_operands = 0 : i64, tpu.core_type = #tpu.core_type<tc>, window_params = [{transform_indices = @transform_0, window_bounds = array<i64: 8, 32>}, {transform_indices = @transform_1, window_bounds = array<i64: 8, 1>}, {transform_indices = @transform_2, window_bounds = array<i64: 1, 8, 128>}]} {
    %c0 = arith.constant 0 : index
    %c0_0 = arith.constant 0 : index
    %0 = vector.load %arg1[%c0, %c0_0] : memref<8x32xf32, #tpu.memory_space<vmem>>, vector<8x32xf32>
    %c0_1 = arith.constant 0 : index
    %c0_2 = arith.constant 0 : index
    %1 = vector.load %arg2[%c0_1, %c0_2] : memref<8x1xi32, #tpu.memory_space<vmem>>, vector<8x1xi32>
    %2 = tpu.iota {dimensions = array<i32: 1>} : vector<8x32xi32>
    %3 = vector.broadcast %1 : vector<8x1xi32> to vector<8x32xi32>
    %4 = arith.cmpi eq, %2, %3 : vector<8x32xi32>
    %cst = arith.constant dense<0xFF800000> : vector<8xf32>
    %5 = vector.multi_reduction <maximumf>, %0, %cst [1] : vector<8x32xf32> to vector<8xf32>
    %6 = vector.shape_cast %5 : vector<8xf32> to vector<8x1xf32>
    %7 = vector.broadcast %6 : vector<8x1xf32> to vector<8x32xf32>
    %8 = arith.subf %0, %7 : vector<8x32xf32>
    %9 = math.exp %8 : vector<8x32xf32>
    %cst_3 = arith.constant dense<0.000000e+00> : vector<8xf32>
    %10 = vector.multi_reduction <add>, %9, %cst_3 [1] : vector<8x32xf32> to vector<8xf32>
    %11 = vector.shape_cast %10 : vector<8xf32> to vector<8x1xf32>
    %12 = math.log %11 : vector<8x1xf32>
    %cst_4 = arith.constant 0.000000e+00 : f32
    %13 = vector.broadcast %cst_4 : f32 to vector<8x32xf32>
    %14 = arith.select %4, %8, %13 : vector<8x32xi1>, vector<8x32xf32>
    %cst_5 = arith.constant dense<0.000000e+00> : vector<8xf32>
    %15 = vector.multi_reduction <add>, %14, %cst_5 [1] : vector<8x32xf32> to vector<8xf32>
    %16 = vector.shape_cast %15 : vector<8xf32> to vector<8x1xf32>
    %17 = arith.subf %12, %16 : vector<8x1xf32>
    %18 = arith.subf %16, %12 : vector<8x1xf32>
    %19 = math.exp %18 : vector<8x1xf32>
    %cst_6 = arith.constant 2.000000e-01 : f32
    %20 = vector.broadcast %cst_6 : f32 to vector<8x1xf32>
    %21 = arith.mulf %20, %19 : vector<8x1xf32>
    %cst_7 = arith.constant 8.000000e-01 : f32
    %22 = vector.broadcast %cst_7 : f32 to vector<8x1xf32>
    %23 = arith.addf %22, %21 : vector<8x1xf32>
    %c8_i32 = arith.constant 8 : i32
    %24 = arith.muli %arg0, %c8_i32 : i32
    %25 = tpu.iota {dimensions = array<i32: 0>} : vector<8x1xi32>
    %26 = vector.broadcast %24 : i32 to vector<8x1xi32>
    %27 = arith.addi %26, %25 : vector<8x1xi32>
    %c8_i32_8 = arith.constant 8 : i32
    %28 = vector.broadcast %c8_i32_8 : i32 to vector<8x1xi32>
    %29 = arith.cmpi slt, %27, %28 : vector<8x1xi32>
    %30 = arith.mulf %17, %23 : vector<8x1xf32>
    %cst_9 = arith.constant 0.000000e+00 : f32
    %31 = vector.broadcast %cst_9 : f32 to vector<8x1xf32>
    %32 = arith.select %29, %30, %31 : vector<8x1xi1>, vector<8x1xf32>
    %33 = vector.shape_cast %32 : vector<8x1xf32> to vector<1x8x1xf32>
    %cst_10 = arith.constant dense<0.000000e+00> : vector<1xf32>
    %34 = vector.multi_reduction <add>, %33, %cst_10 [1, 2] : vector<1x8x1xf32> to vector<1xf32>
    %35 = vector.shape_cast %34 : vector<1xf32> to vector<1x1x1xf32>
    %36 = vector.extract %35[0, 0, 0] : f32 from vector<1x1x1xf32>
    %37 = vector.broadcast %36 : f32 to vector<1x8x128xf32>
    %c0_11 = arith.constant 0 : index
    %c0_12 = arith.constant 0 : index
    %c0_13 = arith.constant 0 : index
    %38 = vector.load %arg3[%c0_11, %c0_12, %c0_13] : memref<1x8x128xf32, #tpu.memory_space<vmem>>, vector<1x8x128xf32>
    tpu.vector_store %arg3[%c0_11, %c0_12, %c0_13], %37 {strides = array<i32>} : memref<1x8x128xf32, #tpu.memory_space<vmem>>, vector<1x8x128xf32>,
    return
  }
  func.func @transform_0(%arg0: i32) -> (i32, i32) {
    %c0_i32 = arith.constant 0 : i32
    %c0_i32_0 = arith.constant 0 : i32
    return %arg0, %c0_i32 : i32, i32
  }
  func.func @transform_1(%arg0: i32) -> (i32, i32) {
    %c0_i32 = arith.constant 0 : i32
    %c0_i32_0 = arith.constant 0 : i32
    return %arg0, %c0_i32 : i32, i32
  }
  func.func @transform_2(%arg0: i32) -> (i32, i32, i32) {
    %c0_i32 = arith.constant 0 : i32
    %c0_i32_0 = arith.constant 0 : i32
    %c0_i32_1 = arith.constant 0 : i32
    return %arg0, %c0_i32, %c0_i32_0 : i32, i32, i32
  }
}

</mosaic_0001>

<bundles_post_ra>
// kernel: tpu_custom_call.1
= control target key start
LH: loop header
LB: loop body
LE: loop exit
PB: predicated region body
PF: predicated region fallthrough
CT: control target
= control target key end

     0   :  { %vm20_vm0 = vcmask 261120   ;;  %s145_s0 = inlined_call_operand.vmem [shape: f32[8,32], index: 0, kind: input, shape index: {}]   ;;  %s146_s1 = inlined_call_operand.vmem [shape: s32[8,1], index: 1, kind: input, shape index: {}]   ;;  %s147_s2 = inlined_call_operand.hbm [shape: f32[1,8,128], index: 2, kind: output, shape index: {}]  }
   0x1   :  { %v12_v0 = vld [vmem:[%s145_s0] sm:$0xff] }
   0x2   :  { %7 = vsyncpa [#allocation3], 0  ;;  %v21_v1 = vsel %vm20_vm0, %v12_v0, -inf  ;;  %v116_v2 = vmov 0   ;;  %v13_v3 = vld [vmem:[%s146_s1] sm:$0xff]  ;;  %v14_v9 = vlaneseq  ;;  %vm50_vm2 = vcmask 7168  }
   0x3   :  { %83 = vset.pattern.permute.xlu0 %v116_v2  ;;  %s117_s0 = smov [#allocation2]   ;;  %s70_s15 = sshll.u32 %s147_s2, 4  ;;  %s71_s15 = int_to_ptr.hbm [resolvable:$true] %s70_s15 }
   0x4   :  { %22 = vmax.xlane.f32.xlu0 %v21_v1  ;;  %v15_v10 = vand.u32 127, %v14_v9  ;;  %s68_s1 = sshll.u32 %s117_s0, 4  ;;  %s69_s1 = int_to_ptr.vmem [resolvable:$true] %s68_s1 }
  0x18   :  { %17 = vperm.xlu0 %83, %v13_v3  }
  0x77   :  { %v23_v4 = vpop.xlane.xlu0 %22 }
  0x78   :  { %v24_v5 = vsub.f32 %v12_v0, %v23_v4 }
  0x7a   :  { %v25_v6 = vmul.f32 1.442695, %v24_v5 }
  0x7c   :  { %84 = vpow2.f32 %v25_v6 }
  0x82   :  { %v85_v7 = vpop.eup %84 }
  0x83   :  { %v27_v8 = vsel %vm20_vm0, %v85_v7, 0.0 }
  0x84   :  { %28 = vadd.xlane.f32.xlu1 %v27_v8 }
  0x8a   :  { %v18_v11 = vpop.permute.xlu0 %17 }
  0x8b   :  { %vm19_vm1 = vcmp.eq.s32.totalorder %v15_v10, %v18_v11 }
  0x8c   :  { %v32_v12 = vsel %vm19_vm1, %v24_v5, 0.0 }
  0x8d   :  { %v33_v13 = vsel %vm20_vm0, %v32_v12, 0.0 }
  0x8e   :  { %34 = vadd.xlane.f32.xlu1 %v33_v13 }
  0xf7   :  { %v29_v14 = vpop.xlane.xlu1 %28 }
  0xf8   :  { %86 = vlog2.f32 %v29_v14 }
  0xfe   :  { %v87_v15 = vpop.eup %86 }
  0xff   :  { %v31_v16 = vmul.f32 0.6931472, %v87_v15 }
 0x101   :  { %v35_v17 = vpop.xlane.xlu1 %34 }
 0x102   :  { %v37_v18 = vsub.f32 %v35_v17, %v31_v16  ;;  %v36_v22 = vsub.f32 %v31_v16, %v35_v17 }
 0x104   :  { %v38_v19 = vmul.f32 1.442695, %v37_v18 }
 0x106   :  { %88 = vpow2.f32 %v38_v19 }
 0x10c   :  { %v89_v20 = vpop.eup %88 }
 0x10d   :  { %v40_v21 = vmul.f32 0.2, %v89_v20 }
 0x10f   :  { %v41_v23 = vadd.f32 0.8, %v40_v21 }
 0x111   :  { %v48_v24 = vmul.f32 %v41_v23, %v36_v22 }
 0x113   :  { %v51_v25 = vsel %vm50_vm2, %v48_v24, 0.0 }
 0x114   :  { %52 = vadd.xlane.f32.xlu2 %v51_v25 }
 0x187   :  { %v53_v26 = vpop.xlane.xlu2 %52 }
 0x188   :  { %v54_v27 = vrot.slane %v53_v26, 4 }
 0x18a   :  { %v55_v28 = vadd.f32 %v54_v27, %v53_v26 }
 0x18c   :  { %v56_v29 = vrot.slane %v55_v28, 2 }
 0x18e   :  { %v57_v30 = vadd.f32 %v56_v29, %v55_v28 }
 0x190   :  { %v58_v31 = vrot.slane %v57_v30, 1 }
 0x192   :  { %v59_v32 = vadd.f32 %v58_v31, %v57_v30 }
 0x194   :  { %79 = vpush %v59_v32 }
 0x1c5   :  { %s80_s16 = spop %79 }
 0x1c6   :  { %v61_v33 = vstv %s80_s16 }
 0x1c7   :  { %62 = vst [vmem:[#allocation2] sm:$0xff] %v61_v33 }
 0x1c8   :  { %73 = dma.vmem_to_hbm [thread:$0]  %s69_s1, 128, %s71_s15, [#allocation3]  }
 0x1c9   :  { %114 = dma.done.wait [#allocation3], 128  }
 0x1ca   :  { %115 = vsyncadd [#allocation3], 4294967168 }
 0x1cb   :  { %78 = vsyncpa [#allocation3], 1 }

</bundles_post_ra>
